<compile_context>
chip_gen: v7x
topology: tpu7x:2x2x1
jax: 0.10.0
libtpu: 0.0.40
codegen_flags: <defaults>
</compile_context>

<pallas_src>
import functools
import math

import jax
import jax.numpy as jnp
from jax.experimental import pallas as pl
from jax.experimental.pallas import tpu as pltpu


def _round_up(x, m):
    return (x + m - 1) // m * m


def _pick_tile(n_pad, weight_dtype, max_tn=512, budget_bytes=24 * 1024 * 1024):
    """Largest TN (multiple of 128, divides n_pad, <= max_tn) whose
    double-buffered fused-weight footprint (both modalities) fits the budget."""
    itemsize = jnp.dtype(weight_dtype).itemsize
    n_lanes = n_pad // 128
    best = 128
    for mult in range(1, n_lanes + 1):
        tn = mult * 128
        if tn > max_tn:
            break
        if n_lanes % mult != 0:
            continue
        # 2 fused weights * 2 pipeline buffers * (n_pad x 3*tn) elements
        if 2 * 2 * n_pad * 3 * tn * itemsize <= budget_bytes:
            best = tn
    return best


def _pad2(w, rows, cols):
    return jnp.pad(w, ((0, rows - w.shape[0]), (0, cols - w.shape[1])))


def pack_gated_bimodal_weights(w1, w2, w3, *, weight_dtype=jnp.bfloat16, tn=None):
    """Pre-pack (W1, W2, W3) into two fused, column-tiled weight tensors.

    Returns (wa, wb), each of shape (T, N_pad, 3*TN):
      wa[j] = [ W3[:N,:N][:, tile j] | W3[:N,N:][:, tile j] | W1[:, tile j] ]
      wb[j] = [ W3[N:,:N][:, tile j] | W3[N:,N:][:, tile j] | W2[:, tile j] ]
    """
    n = w1.shape[0]
    n_pad = _round_up(n, 128)
    if tn is None:
        tn = _pick_tile(n_pad, weight_dtype)
    assert n_pad % tn == 0 and tn % 128 == 0
    num_tiles = n_pad // tn

    w1p = _pad2(w1, n_pad, n_pad)
    w2p = _pad2(w2, n_pad, n_pad)
    w3_tl = _pad2(w3[:n, :n], n_pad, n_pad)
    w3_tr = _pad2(w3[:n, n:], n_pad, n_pad)
    w3_bl = _pad2(w3[n:, :n], n_pad, n_pad)
    w3_br = _pad2(w3[n:, n:], n_pad, n_pad)

    def fuse(gate_a, gate_b, proj):
        parts = [
            gate_a.reshape(n_pad, num_tiles, tn),
            gate_b.reshape(n_pad, num_tiles, tn),
            proj.reshape(n_pad, num_tiles, tn),
        ]
        fused = jnp.concatenate(parts, axis=2)             # (N_pad, T, 3*TN)
        fused = jnp.transpose(fused, (1, 0, 2))            # (T, N_pad, 3*TN)
        return fused.astype(weight_dtype)

    wa = fuse(w3_tl, w3_tr, w1p)
    wb = fuse(w3_bl, w3_br, w2p)
    return wa, wb


def _gated_bimodal_kernel(x1_ref, x2_ref, wa_ref, wb_ref, out_ref, *, tn):
    # x1_ref, x2_ref : (1, N_pad)      VMEM-resident across the whole grid
    # wa_ref, wb_ref : (N_pad, 3*TN)   fused weight column tile j
    # out_ref        : (1, TN)         lane-dense output tile j
    a = jnp.dot(x1_ref[...], wa_ref[...], preferred_element_type=jnp.float32)
    b = jnp.dot(x2_ref[...], wb_ref[...], preferred_element_type=jnp.float32)

    # Slice points tn / 2*tn are multiples of 128 -> lane-aligned, no shuffles.
    z1 = jax.nn.sigmoid(a[:, :tn] + b[:, :tn])               # gate for modality 1
    z2 = jax.nn.sigmoid(a[:, tn:2 * tn] + b[:, tn:2 * tn])   # gate for modality 2
    t1 = jnp.tanh(a[:, 2 * tn:])                              # tanh(x1 @ W1) tile
    t2 = jnp.tanh(b[:, 2 * tn:])                              # tanh(x2 @ W2) tile

    out_ref[...] = (z1 * t1 + (1.0 - z2) * t2).astype(out_ref.dtype)


def gated_bimodal_packed(x1, x2, wa, wb, n):
    """Run the kernel with pre-packed weights. x1, x2: (n,). Returns (n,)."""
    num_tiles, n_pad, three_tn = wa.shape
    tn = three_tn // 3
    wdtype = wa.dtype

    x1r = jnp.pad(x1, (0, n_pad - n)).reshape(1, n_pad).astype(wdtype)
    x2r = jnp.pad(x2, (0, n_pad - n)).reshape(1, n_pad).astype(wdtype)

    kernel = functools.partial(_gated_bimodal_kernel, tn=tn)
    out = pl.pallas_call(
        kernel,
        out_shape=jax.ShapeDtypeStruct((1, n_pad), jnp.float32),
        grid_spec=pltpu.PrefetchScalarGridSpec(
            num_scalar_prefetch=0,
            grid=(num_tiles,),
            in_specs=[
                pl.BlockSpec((1, n_pad), lambda j: (0, 0)),                # x1 resident
                pl.BlockSpec((1, n_pad), lambda j: (0, 0)),                # x2 resident
                pl.BlockSpec((None, n_pad, 3 * tn), lambda j: (j, 0, 0)),  # WA tile j
                pl.BlockSpec((None, n_pad, 3 * tn), lambda j: (j, 0, 0)),  # WB tile j
            ],
            out_specs=pl.BlockSpec((1, tn), lambda j: (0, j)),
        ),
        compiler_params=pltpu.CompilerParams(
            dimension_semantics=("parallel",),         # v7x: 2 TCs split the columns
            vmem_limit_bytes=32 * 1024 * 1024,          # safe on v5e/v6e/v7x
        ),
    )(x1r, x2r, wa, wb)
    return out[0, :n]


def gated_bimodal(x1, x2, w1, w2, w3, *, weight_dtype=jnp.bfloat16, tn=None):
    """Convenience wrapper: pack weights then run (in practice, pack once)."""
    n = x1.shape[0]
    wa, wb = pack_gated_bimodal_weights(w1, w2, w3, weight_dtype=weight_dtype, tn=tn)
    return gated_bimodal_packed(x1, x2, wa, wb, n)


def _reference(x1, x2, w1, w2, w3):
    n = x1.shape[0]
    cat = jnp.concatenate([x1, x2], axis=0)
    z = jax.nn.sigmoid(cat @ w3)
    return z[:n] * jnp.tanh(x1 @ w1) + (1.0 - z[n:]) * jnp.tanh(x2 @ w2)


def _make_inputs(key, n):
    k_x1, k_x2, k_w1, k_w2, k_w3 = jax.random.split(key, 5)
    std = 1.0 / math.sqrt(n)  # reset_parameters(): U(-std, std)
    w1 = jax.random.uniform(k_w1, (n, n), jnp.float32, minval=-std, maxval=std)
    w2 = jax.random.uniform(k_w2, (n, n), jnp.float32, minval=-std, maxval=std)
    w3 = jax.random.uniform(k_w3, (2 * n, 2 * n), jnp.float32, minval=-std, maxval=std)
    x1 = jax.random.normal(k_x1, (n,), jnp.float32)
    x2 = jax.random.normal(k_x2, (n,), jnp.float32)
    return x1, x2, w1, w2, w3


if __name__ == "__main__":
    key = jax.random.PRNGKey(0)

    # Test 1: module-sized case (input_size=32), f32 weights -> exactness of
    # the restructured (split / fused / padded) computation.  Single tile.
    N = 32
    x1, x2, w1, w2, w3 = _make_inputs(key, N)
    out_f32 = gated_bimodal(x1, x2, w1, w2, w3, weight_dtype=jnp.float32)
    jax.block_until_ready(out_f32)
    ref = _reference(x1, x2, w1, w2, w3)
    assert out_f32.shape == (N,)
    assert jnp.allclose(out_f32, ref, atol=1e-5, rtol=1e-5), "f32 path mismatch"

    # Test 2: non-multiple-of-128 size with a multi-tile grid (TN=128, 3 tiles)
    # on the default bf16 weight path (bandwidth win; f32 MXU accumulation, so
    # only bf16 input/weight rounding error remains).
    N2 = 300
    x1b, x2b, w1b, w2b, w3b = _make_inputs(jax.random.PRNGKey(1), N2)
    out_bf16 = gated_bimodal(x1b, x2b, w1b, w2b, w3b, tn=128)  # bf16 default
    jax.block_until_ready(out_bf16)
    refb = _reference(x1b, x2b, w1b, w2b, w3b)
    assert out_bf16.shape == (N2,)
    assert jnp.allclose(out_bf16, refb, atol=6e-2, rtol=6e-2), "bf16 path mismatch"

    print("KERNEL_OK")
</pallas_src>

<mosaic_0001>
module attributes {stable_mosaic.version = 11 : i64} {
  func.func @_gated_bimodal_kernel(%arg0: i32, %arg1: memref<1x128xf32, #tpu.memory_space<vmem>>, %arg2: memref<1x128xf32, #tpu.memory_space<vmem>>, %arg3: memref<1x128x384xf32, #tpu.memory_space<vmem>>, %arg4: memref<1x128x384xf32, #tpu.memory_space<vmem>>, %arg5: memref<1x128xf32, #tpu.memory_space<vmem>>) attributes {dimension_semantics = [#tpu.dimension_semantics<parallel>], iteration_bounds = array<i64: 1>, scalar_prefetch = 0 : i64, scratch_operands = 0 : i64, tpu.core_type = #tpu.core_type<tc>, window_params = [{pipeline_mode = #tpu.pipeline_mode<synchronous>, transform_indices = @transform_0, window_bounds = array<i64: 1, 128>}, {pipeline_mode = #tpu.pipeline_mode<synchronous>, transform_indices = @transform_1, window_bounds = array<i64: 1, 128>}, {transform_indices = @transform_2, window_bounds = array<i64: 1, 128, 384>}, {transform_indices = @transform_3, window_bounds = array<i64: 1, 128, 384>}, {transform_indices = @transform_4, window_bounds = array<i64: 1, 128>}]} {
    %c0 = arith.constant 0 : index
    %c0_0 = arith.constant 0 : index
    %0 = vector.load %arg1[%c0, %c0_0] : memref<1x128xf32, #tpu.memory_space<vmem>>, vector<1x128xf32>
    %c0_1 = arith.constant 0 : index
    %c0_2 = arith.constant 0 : index
    %c0_3 = arith.constant 0 : index
    %1 = vector.load %arg3[%c0_1, %c0_2, %c0_3] : memref<1x128x384xf32, #tpu.memory_space<vmem>>, vector<1x128x384xf32>
    %2 = vector.shape_cast %1 : vector<1x128x384xf32> to vector<128x384xf32>
    %cst = arith.constant dense<0.000000e+00> : vector<1x384xf32>
    %3 = tpu.matmul %0, %2, %cst {dimension_numbers = #tpu.dot_dimension_numbers<[1], [0], [0], [1], [0, 0, 1, 1], [], []>} : vector<1x128xf32>, vector<128x384xf32>, vector<1x384xf32> -> vector<1x384xf32>
    %c0_4 = arith.constant 0 : index
    %c0_5 = arith.constant 0 : index
    %4 = vector.load %arg2[%c0_4, %c0_5] : memref<1x128xf32, #tpu.memory_space<vmem>>, vector<1x128xf32>
    %c0_6 = arith.constant 0 : index
    %c0_7 = arith.constant 0 : index
    %c0_8 = arith.constant 0 : index
    %5 = vector.load %arg4[%c0_6, %c0_7, %c0_8] : memref<1x128x384xf32, #tpu.memory_space<vmem>>, vector<1x128x384xf32>
    %6 = vector.shape_cast %5 : vector<1x128x384xf32> to vector<128x384xf32>
    %cst_9 = arith.constant dense<0.000000e+00> : vector<1x384xf32>
    %7 = tpu.matmul %4, %6, %cst_9 {dimension_numbers = #tpu.dot_dimension_numbers<[1], [0], [0], [1], [0, 0, 1, 1], [], []>} : vector<1x128xf32>, vector<128x384xf32>, vector<1x384xf32> -> vector<1x384xf32>
    %8 = vector.extract_strided_slice %3 {offsets = [0, 0], sizes = [1, 128], strides = [1, 1]} : vector<1x384xf32> to vector<1x128xf32>
    %9 = vector.extract_strided_slice %7 {offsets = [0, 0], sizes = [1, 128], strides = [1, 1]} : vector<1x384xf32> to vector<1x128xf32>
    %10 = arith.addf %8, %9 : vector<1x128xf32>
    %11 = arith.negf %10 : vector<1x128xf32>
    %12 = math.exp %11 : vector<1x128xf32>
    %cst_10 = arith.constant 1.000000e+00 : f32
    %13 = vector.broadcast %cst_10 : f32 to vector<1x128xf32>
    %14 = arith.addf %13, %12 : vector<1x128xf32>
    %15 = arith.divf %13, %14 : vector<1x128xf32>
    %16 = vector.extract_strided_slice %3 {offsets = [0, 128], sizes = [1, 128], strides = [1, 1]} : vector<1x384xf32> to vector<1x128xf32>
    %17 = vector.extract_strided_slice %7 {offsets = [0, 128], sizes = [1, 128], strides = [1, 1]} : vector<1x384xf32> to vector<1x128xf32>
    %18 = arith.addf %16, %17 : vector<1x128xf32>
    %19 = arith.negf %18 : vector<1x128xf32>
    %20 = math.exp %19 : vector<1x128xf32>
    %cst_11 = arith.constant 1.000000e+00 : f32
    %21 = vector.broadcast %cst_11 : f32 to vector<1x128xf32>
    %22 = arith.addf %21, %20 : vector<1x128xf32>
    %23 = arith.divf %21, %22 : vector<1x128xf32>
    %24 = vector.extract_strided_slice %3 {offsets = [0, 256], sizes = [1, 128], strides = [1, 1]} : vector<1x384xf32> to vector<1x128xf32>
    %25 = math.tanh %24 : vector<1x128xf32>
    %26 = vector.extract_strided_slice %7 {offsets = [0, 256], sizes = [1, 128], strides = [1, 1]} : vector<1x384xf32> to vector<1x128xf32>
    %27 = math.tanh %26 : vector<1x128xf32>
    %28 = arith.mulf %15, %25 : vector<1x128xf32>
    %cst_12 = arith.constant 1.000000e+00 : f32
    %29 = vector.broadcast %cst_12 : f32 to vector<1x128xf32>
    %30 = arith.subf %29, %23 : vector<1x128xf32>
    %31 = arith.mulf %30, %27 : vector<1x128xf32>
    %32 = arith.addf %28, %31 : vector<1x128xf32>
    %c0_13 = arith.constant 0 : index
    %c0_14 = arith.constant 0 : index
    %33 = vector.load %arg5[%c0_13, %c0_14] : memref<1x128xf32, #tpu.memory_space<vmem>>, vector<1x128xf32>
    tpu.vector_store %arg5[%c0_13, %c0_14], %32 {strides = array<i32>} : memref<1x128xf32, #tpu.memory_space<vmem>>, vector<1x128xf32>,
    return
  }
  func.func @transform_0(%arg0: i32) -> (i32, i32) {
    %c0_i32 = arith.constant 0 : i32
    %c0_i32_0 = arith.constant 0 : i32
    %c0_i32_1 = arith.constant 0 : i32
    return %c0_i32, %c0_i32_0 : i32, i32
  }
  func.func @transform_1(%arg0: i32) -> (i32, i32) {
    %c0_i32 = arith.constant 0 : i32
    %c0_i32_0 = arith.constant 0 : i32
    %c0_i32_1 = arith.constant 0 : i32
    return %c0_i32, %c0_i32_0 : i32, i32
  }
  func.func @transform_2(%arg0: i32) -> (i32, i32, i32) {
    %c0_i32 = arith.constant 0 : i32
    %c0_i32_0 = arith.constant 0 : i32
    %c0_i32_1 = arith.constant 0 : i32
    return %arg0, %c0_i32, %c0_i32_0 : i32, i32, i32
  }
  func.func @transform_3(%arg0: i32) -> (i32, i32, i32) {
    %c0_i32 = arith.constant 0 : i32
    %c0_i32_0 = arith.constant 0 : i32
    %c0_i32_1 = arith.constant 0 : i32
    return %arg0, %c0_i32, %c0_i32_0 : i32, i32, i32
  }
  func.func @transform_4(%arg0: i32) -> (i32, i32) {
    %c0_i32 = arith.constant 0 : i32
    %c0_i32_0 = arith.constant 0 : i32
    return %c0_i32, %arg0 : i32, i32
  }
}

</mosaic_0001>

<bundles_post_ra>
// kernel: tpu_custom_call.1
= control target key start
LH: loop header
LB: loop body
LE: loop exit
PB: predicated region body
PF: predicated region fallthrough
CT: control target
= control target key end

     0   :  { %9 = vsyncpa [#allocation3], 0  ;;  %s922_s0 = inlined_call_operand.hbm [shape: f32[1,128], index: 0, kind: input, shape index: {}]   ;;  %s923_s1 = inlined_call_operand.vmem [shape: f32[1,128], index: 1, kind: input, shape index: {}]   ;;  %s924_s2 = inlined_call_operand.hbm [shape: f32[1,128,384], index: 2, kind: input, shape index: {}]   ;;  %s925_s3 = inlined_call_operand.hbm [shape: f32[1,128,384], index: 3, kind: input, shape index: {}]   ;;  %s926_s4 = inlined_call_operand.hbm [shape: f32[1,128], index: 4, kind: output, shape index: {}]  }
   0x1   :  { %10 = vsyncpa [#allocation6], 0 }
   0x2   :  { %11 = vsyncpa [#allocation4], 0  ;;  %s809_s15 = smov [#allocation5]   ;;  %s715_s19 = scalar_lea.hbm %s924_s2, 6144 }
   0x3   :  { %s29_s16 = sshll.u32 %s809_s15, 4  ;;  %p716_p0 = scmp.ne.s32.totalorder %s924_s2, %s715_s19  ;;  %s30_s16 = int_to_ptr.vmem [resolvable:$true] %s29_s16 }
   0x4   :  { %p719_p1 = scmp.lt.u32.totalorder %s715_s19, %s924_s2 }
   0x6   :  { %p721_p2 = pnand %p719_p1, %p716_p0 }
   0x8   :  { %724 = shalt.err (!%p721_p2)
}
   0x9   :  { %s725_s24 = scalar_lea.vmem %s30_s16, 6144  ;;  %p730_p4 = scmp.lt.s32.totalorder %s30_s16, %s30_s16 }
   0xa   :  { %p726_p3 = scmp.ne.s32.totalorder %s30_s16, %s725_s24  ;;  %p731_p5 = scmp.lt.s32.totalorder %s725_s24, %s725_s24 }
   0xc   :  { %p732_p6 = por %p731_p5, %p730_p4 }
   0xe   :  { %p733_p7 = pnand %p732_p6, %p726_p3 }
  0x10   :  { %736 = shalt.err (!%p733_p7)
}
  0x11   :  { %s810_s25 = smov 384   ;;  %s811_s26 = smov 24  }
  0x12   :  { %35 = dma.hbm_to_vmem [thread:$0]  %s924_s2, 6144, %s30_s16, [#allocation6], %s810_s25, %s810_s25, %s811_s26  }
  0x13   :  { %s812_s29 = smov [#allocation2]   ;;  %s813_s5 = smov [#allocation7]  }
  0x14   :  { %s18_s30 = sshll.u32 %s812_s29, 4  ;;  %s41_s6 = sshll.u32 %s813_s5, 4  ;;  %s19_s30 = int_to_ptr.vmem [resolvable:$true] %s18_s30  ;;  %s42_s6 = int_to_ptr.vmem [resolvable:$true] %s41_s6 }
  0x15   :  { %s737_s9 = scalar_lea.hbm %s922_s0, 16 }
  0x16   :  { %p738_p8 = scmp.ne.s32.totalorder %s922_s0, %s737_s9  ;;  %p741_p9 = scmp.lt.u32.totalorder %s737_s9, %s922_s0 }
  0x18   :  { %p743_p10 = pnand %p741_p9, %p738_p8 }
  0x1a   :  { %746 = shalt.err (!%p743_p10)
}
  0x1b   :  { %s747_s2 = scalar_lea.vmem %s19_s30, 16  ;;  %s751_s14 = scalar_lea.vmem %s19_s30, 32 }
  0x1c   :  { %p748_p11 = scmp.ne.s32.totalorder %s19_s30, %s747_s2  ;;  %p752_p12 = scmp.lt.s32.totalorder %s19_s30, %s19_s30 }
  0x1d   :  { %p753_p13 = scmp.lt.s32.totalorder %s751_s14, %s747_s2 }
  0x1f   :  { %p754_p0 = por %p753_p13, %p752_p12 }
  0x21   :  { %p755_p1 = pnand %p754_p0, %p748_p11 }
  0x23   :  { %758 = shalt.err (!%p755_p1)
}
  0x24   :  { %21 = dma.hbm_to_vmem [thread:$0]  %s922_s0, 16, %s19_s30, [#allocation3]  }
  0x25   :  { %s759_s19 = scalar_lea.hbm %s925_s3, 6144 }
  0x26   :  { %p760_p2 = scmp.ne.s32.totalorder %s925_s3, %s759_s19  ;;  %p763_p3 = scmp.lt.u32.totalorder %s759_s19, %s925_s3 }
  0x28   :  { %p765_p4 = pnand %p763_p3, %p760_p2 }
  0x2a   :  { %768 = shalt.err (!%p765_p4)
}
  0x2b   :  { %s769_s24 = scalar_lea.vmem %s42_s6, 6144  ;;  %p774_p6 = scmp.lt.s32.totalorder %s42_s6, %s42_s6 }
  0x2c   :  { %p770_p5 = scmp.ne.s32.totalorder %s42_s6, %s769_s24  ;;  %p775_p7 = scmp.lt.s32.totalorder %s769_s24, %s769_s24 }
  0x2e   :  { %p776_p8 = por %p775_p7, %p774_p6 }
  0x30   :  { %p777_p9 = pnand %p776_p8, %p770_p5 }
  0x32   :  { %780 = shalt.err (!%p777_p9)
}
  0x33   :  { %47 = dma.hbm_to_vmem [thread:$0]  %s925_s3, 6144, %s42_s6, [#allocation6], %s810_s25, %s810_s25, %s811_s26  }
  0x34   :  { %803 = dma.done.wait [#allocation3], 16  }
  0x35   :  { %804 = vsyncadd [#allocation3], 4294967280 }
  0x36   :  { %805 = dma.done.wait [#allocation6], 12288  }
  0x37   :  { %806 = vsyncadd [#allocation6], 4294955008  ;;  %v814_v0 = vmov 0.0|0.0   ;;  %v815_v1 = vmov 0.0   ;;  %vm816_vm0 = vmmov 0   ;;  %v59_v2 = vld [vmem:[#allocation5 + $0x8] sm:$0xff] }
  0x38   :  { %612 = vmatprep.subr.bf16.mxu1 %v814_v0  ;;  %170 = vmatprep.mubr.f32.mxu0 %v815_v1  ;;  %v62_v3 = vld [vmem:[#allocation5 + $0x20] sm:$0xff]  ;;  %v61_v6 = vld [vmem:[#allocation5 + $0x18] sm:$0xff]  ;;  %v68_v8 = vld [vmem:[#allocation5 + $0x50] sm:$0xff] }
  0x39   :  { %542 = vmatprep.mubr.msk.f32.mxu1 %vm816_vm0, %v815_v1  ;;  %v58_v4 = vld [vmem:[#allocation5] sm:$0xff]  ;;  %v580_v5 = vpack.c.bf16 %v62_v3, %v59_v2  ;;  %v65_v7 = vld [vmem:[#allocation5 + $0x38] sm:$0xff]  ;;  %v64_v11 = vld [vmem:[#allocation5 + $0x30] sm:$0xff] }
  0x3a   :  { %v582_v9 = vpack.c.bf16 %v61_v6, %v58_v4  ;;  %v584_v10 = vpack.c.bf16 %v68_v8, %v65_v7  ;;  %v67_v12 = vld [vmem:[#allocation5 + $0x48] sm:$0xff]  ;;  %v74_v14 = vld [vmem:[#allocation5 + $0x80] sm:$0xff]  ;;  %v73_v18 = vld [vmem:[#allocation5 + $0x78] sm:$0xff] }
  0x3b   :  { %v71_v13 = vld [vmem:[#allocation5 + $0x68] sm:$0xff]  ;;  %581 = vmatprep.subr.bf16.mxu0 %v580_v5  ;;  %v586_v15 = vpack.c.bf16 %v67_v12, %v64_v11  ;;  %v70_v17 = vld [vmem:[#allocation5 + $0x60] sm:$0xff]  ;;  %v77_v19 = vld [vmem:[#allocation5 + $0x98] sm:$0xff] }
  0x3c   :  { %583 = vmatpush1.bf16.msra.mxu0 %v582_v9  ;;  %v588_v16 = vpack.c.bf16 %v74_v14, %v71_v13  ;;  %v80_v20 = vld [vmem:[#allocation5 + $0xb0] sm:$0xff]  ;;  %v63_v22 = vld [vmem:[#allocation5 + $0x28] sm:$0xff]  ;;  %v590_v23 = vpack.c.bf16 %v73_v18, %v70_v17  ;;  %v66_v25 = vld [vmem:[#allocation5 + $0x40] sm:$0xff] }
  0x3d   :  { %585 = vmatprep.subr.bf16.mxu0 %v584_v10  ;;  %v60_v21 = vld [vmem:[#allocation5 + $0x10] sm:$0xff]  ;;  %v592_v26 = vpack.c.bf16 %v80_v20, %v77_v19  ;;  %v79_v28 = vld [vmem:[#allocation5 + $0xa8] sm:$0xff]  ;;  %v69_v29 = vld [vmem:[#allocation5 + $0x58] sm:$0xff] }
  0x3e   :  { %v613_v24 = vpack.c.bf16 %v63_v22, %v60_v21  ;;  %v76_v27 = vld [vmem:[#allocation5 + $0x90] sm:$0xff]  ;;  %v83_v30 = vld [vmem:[#allocation5 + $0xc8] sm:$0xff]  ;;  %v86_v31 = vld [vmem:[#allocation5 + $0xe0] sm:$0xff]  ;;  %v616_v32 = vpack.c.bf16 %v69_v29, %v66_v25 }
  0x3f   :  { %v72_v33 = vld [vmem:[#allocation5 + $0x70] sm:$0xff]  ;;  %v75_v34 = vld [vmem:[#allocation5 + $0x88] sm:$0xff]  ;;  %v594_v35 = vpack.c.bf16 %v79_v28, %v76_v27  ;;  %v596_v36 = vpack.c.bf16 %v86_v31, %v83_v30  ;;  %v82_v37 = vld [vmem:[#allocation5 + $0xc0] sm:$0xff] }
  0x40   :  { %587 = vmatpush1.bf16.msra.mxu0 %v586_v15  ;;  %614 = vmatpush3.bf16.msra.mxu1 %v613_v24  ;;  %v85_v38 = vld [vmem:[#allocation5 + $0xd8] sm:$0xff]  ;;  %v92_v40 = vld [vmem:[#allocation5 + $0x110] sm:$0xff]  ;;  %v619_v41 = vpack.c.bf16 %v75_v34, %v72_v33  ;;  %v78_v42 = vld [vmem:[#allocation5 + $0xa0] sm:$0xff] }
  0x41   :  { %589 = vmatprep.subr.bf16.mxu0 %v588_v16  ;;  %615 = vmatprep.subr.bf16.mxu1 %v814_v0  ;;  %v89_v39 = vld [vmem:[#allocation5 + $0xf8] sm:$0xff]  ;;  %v598_v44 = vpack.c.bf16 %v85_v38, %v82_v37  ;;  %v88_v46 = vld [vmem:[#allocation5 + $0xf0] sm:$0xff]  ;;  %v91_v47 = vld [vmem:[#allocation5 + $0x108] sm:$0xff] }
  0x42   :  { %v81_v43 = vld [vmem:[#allocation5 + $0xb8] sm:$0xff]  ;;  %v600_v45 = vpack.c.bf16 %v92_v40, %v89_v39  ;;  %v95_v48 = vld [vmem:[#allocation5 + $0x128] sm:$0xff]  ;;  %v98_v49 = vld [vmem:[#allocation5 + $0x140] sm:$0xff]  ;;  %v602_v53 = vpack.c.bf16 %v91_v47, %v88_v46 }
  0x43   :  { %v622_v50 = vpack.c.bf16 %v81_v43, %v78_v42  ;;  %v84_v51 = vld [vmem:[#allocation5 + $0xd0] sm:$0xff]  ;;  %v87_v52 = vld [vmem:[#allocation5 + $0xe8] sm:$0xff]  ;;  %v604_v54 = vpack.c.bf16 %v98_v49, %v95_v48  ;;  %v94_v55 = vld [vmem:[#allocation5 + $0x120] sm:$0xff] }
  0x44   :  { %591 = vmatpush1.bf16.msra.mxu0 %v590_v23  ;;  %617 = vmatpush3.bf16.msra.mxu1 %v616_v32  ;;  %v97_v56 = vld [vmem:[#allocation5 + $0x138] sm:$0xff]  ;;  %v104_v58 = vld [vmem:[#allocation5 + $0x170] sm:$0xff]  ;;  %v625_v59 = vpack.c.bf16 %v87_v52, %v84_v51  ;;  %v90_v60 = vld [vmem:[#allocation5 + $0x100] sm:$0xff] }
  0x45   :  { %593 = vmatprep.subr.bf16.mxu0 %v592_v26  ;;  %618 = vmatprep.subr.bf16.mxu1 %v814_v0  ;;  %v101_v57 = vld [vmem:[#allocation5 + $0x158] sm:$0xff]  ;;  %v606_v62 = vpack.c.bf16 %v97_v56, %v94_v55  ;;  %v100_v2 = vld [vmem:[#allocation5 + $0x150] sm:$0xff]  ;;  %v103_v3 = vld [vmem:[#allocation5 + $0x168] sm:$0xff] }
  0x46   :  { %v93_v61 = vld [vmem:[#allocation5 + $0x118] sm:$0xff]  ;;  %v608_v63 = vpack.c.bf16 %v104_v58, %v101_v57  ;;  %v249_v4 = vld [vmem:[#allocation7 + $0x8] sm:$0xff]  ;;  %v252_v5 = vld [vmem:[#allocation7 + $0x20] sm:$0xff]  ;;  %v610_v9 = vpack.c.bf16 %v103_v3, %v100_v2 }
  0x47   :  { %v628_v6 = vpack.c.bf16 %v93_v61, %v90_v60  ;;  %v96_v7 = vld [vmem:[#allocation5 + $0x130] sm:$0xff]  ;;  %v99_v8 = vld [vmem:[#allocation5 + $0x148] sm:$0xff]  ;;  %v636_v10 = vpack.c.bf16 %v252_v5, %v249_v4  ;;  %v248_v11 = vld [vmem:[#allocation7] sm:$0xff] }
  0x48   :  { %595 = vmatpush1.bf16.msra.mxu0 %v594_v35  ;;  %620 = vmatpush3.bf16.msra.mxu1 %v619_v41  ;;  %v251_v12 = vld [vmem:[#allocation7 + $0x18] sm:$0xff]  ;;  %v258_v14 = vld [vmem:[#allocation7 + $0x50] sm:$0xff]  ;;  %v631_v15 = vpack.c.bf16 %v99_v8, %v96_v7  ;;  %v102_v16 = vld [vmem:[#allocation5 + $0x160] sm:$0xff] }
  0x49   :  { %597 = vmatprep.subr.bf16.mxu0 %v596_v36  ;;  %621 = vmatprep.subr.bf16.mxu1 %v814_v0  ;;  %v255_v13 = vld [vmem:[#allocation7 + $0x38] sm:$0xff]  ;;  %v638_v19 = vpack.c.bf16 %v251_v12, %v248_v11  ;;  %v254_v21 = vld [vmem:[#allocation7 + $0x30] sm:$0xff]  ;;  %v257_v22 = vld [vmem:[#allocation7 + $0x48] sm:$0xff] }
  0x4a   :  { %v105_v17 = vld [vmem:[#allocation5 + $0x178] sm:$0xff]  ;;  %v640_v20 = vpack.c.bf16 %v258_v14, %v255_v13  ;;  %v261_v23 = vld [vmem:[#allocation7 + $0x68] sm:$0xff]  ;;  %v264_v24 = vld [vmem:[#allocation7 + $0x80] sm:$0xff]  ;;  %v642_v28 = vpack.c.bf16 %v257_v22, %v254_v21 }
  0x4b   :  { %v57_v18 = vld [vmem:[#allocation2] sm:$0x1]  ;;  %v634_v25 = vpack.c.bf16 %v105_v17, %v102_v16  ;;  %v250_v26 = vld [vmem:[#allocation7 + $0x10] sm:$0xff]  ;;  %v253_v27 = vld [vmem:[#allocation7 + $0x28] sm:$0xff]  ;;  %v644_v29 = vpack.c.bf16 %v264_v24, %v261_v23 }
  0x4c   :  { %599 = vmatpush1.bf16.msra.mxu0 %v598_v44  ;;  %623 = vmatpush3.bf16.msra.mxu1 %v622_v50  ;;  %v260_v30 = vld [vmem:[#allocation7 + $0x60] sm:$0xff]  ;;  %v263_v31 = vld [vmem:[#allocation7 + $0x78] sm:$0xff]  ;;  %v270_v33 = vld [vmem:[#allocation7 + $0xb0] sm:$0xff]  ;;  %v669_v34 = vpack.c.bf16 %v253_v27, %v250_v26 }
  0x4d   :  { %601 = vmatprep.subr.bf16.mxu0 %v600_v45  ;;  %624 = vmatprep.subr.bf16.mxu1 %v814_v0  ;;  %v267_v32 = vld [vmem:[#allocation7 + $0x98] sm:$0xff]  ;;  %v256_v35 = vld [vmem:[#allocation7 + $0x40] sm:$0xff]  ;;  %v646_v37 = vpack.c.bf16 %v263_v31, %v260_v30  ;;  %v266_v39 = vld [vmem:[#allocation7 + $0x90] sm:$0xff] }
  0x4e   :  { %v259_v36 = vld [vmem:[#allocation7 + $0x58] sm:$0xff]  ;;  %v648_v38 = vpack.c.bf16 %v270_v33, %v267_v32  ;;  %v269_v40 = vld [vmem:[#allocation7 + $0xa8] sm:$0xff]  ;;  %v276_v42 = vld [vmem:[#allocation7 + $0xe0] sm:$0xff] }
  0x4f   :  { %v273_v41 = vld [vmem:[#allocation7 + $0xc8] sm:$0xff]  ;;  %v672_v43 = vpack.c.bf16 %v259_v36, %v256_v35  ;;  %v262_v44 = vld [vmem:[#allocation7 + $0x70] sm:$0xff]  ;;  %v650_v46 = vpack.c.bf16 %v269_v40, %v266_v39  ;;  %v272_v48 = vld [vmem:[#allocation7 + $0xc0] sm:$0xff] }
  0x50   :  { %603 = vmatpush1.bf16.msra.mxu0 %v602_v53  ;;  %626 = vmatpush3.bf16.msra.mxu1 %v625_v59  ;;  %v265_v45 = vld [vmem:[#allocation7 + $0x88] sm:$0xff]  ;;  %v652_v47 = vpack.c.bf16 %v276_v42, %v273_v41  ;;  %v275_v49 = vld [vmem:[#allocation7 + $0xd8] sm:$0xff]  ;;  %v282_v51 = vld [vmem:[#allocation7 + $0x110] sm:$0xff] }
  0x51   :  { %605 = vmatprep.subr.bf16.mxu0 %v604_v54  ;;  %627 = vmatprep.subr.bf16.mxu1 %v814_v0  ;;  %v279_v50 = vld [vmem:[#allocation7 + $0xf8] sm:$0xff]  ;;  %v675_v52 = vpack.c.bf16 %v265_v45, %v262_v44  ;;  %v268_v53 = vld [vmem:[#allocation7 + $0xa0] sm:$0xff]  ;;  %v278_v56 = vld [vmem:[#allocation7 + $0xf0] sm:$0xff] }
  0x52   :  { %v271_v54 = vld [vmem:[#allocation7 + $0xb8] sm:$0xff]  ;;  %v656_v55 = vpack.c.bf16 %v282_v51, %v279_v50  ;;  %v281_v57 = vld [vmem:[#allocation7 + $0x108] sm:$0xff]  ;;  %v288_v59 = vld [vmem:[#allocation7 + $0x140] sm:$0xff] }
  0x53   :  { %v285_v58 = vld [vmem:[#allocation7 + $0x128] sm:$0xff]  ;;  %v678_v60 = vpack.c.bf16 %v271_v54, %v268_v53  ;;  %v274_v61 = vld [vmem:[#allocation7 + $0xd0] sm:$0xff]  ;;  %v284_v3 = vld [vmem:[#allocation7 + $0x120] sm:$0xff] }
  0x54   :  { %607 = vmatpush1.bf16.msra.mxu0 %v606_v62  ;;  %629 = vmatpush3.bf16.msra.mxu1 %v628_v6  ;;  %v277_v62 = vld [vmem:[#allocation7 + $0xe8] sm:$0xff]  ;;  %v660_v2 = vpack.c.bf16 %v288_v59, %v285_v58  ;;  %v287_v4 = vld [vmem:[#allocation7 + $0x138] sm:$0xff]  ;;  %v294_v6 = vld [vmem:[#allocation7 + $0x170] sm:$0xff] }
  0x55   :  { %609 = vmatprep.subr.bf16.mxu0 %v608_v63  ;;  %630 = vmatprep.subr.bf16.mxu1 %v814_v0  ;;  %v658_v63 = vpack.c.bf16 %v281_v57, %v278_v56  ;;  %v291_v5 = vld [vmem:[#allocation7 + $0x158] sm:$0xff]  ;;  %v681_v7 = vpack.c.bf16 %v277_v62, %v274_v61  ;;  %v280_v8 = vld [vmem:[#allocation7 + $0x100] sm:$0xff]  ;;  %v290_v12 = vld [vmem:[#allocation7 + $0x150] sm:$0xff] }
  0x56   :  { %v664_v11 = vpack.c.bf16 %v294_v6, %v291_v5  ;;  %v293_v13 = vld [vmem:[#allocation7 + $0x168] sm:$0xff]  ;;  %v247_v21 = vld [vmem:[%s923_s1] sm:$0x1]  ;;  %s817_s1 = smov [#allocation8]  }
  0x57   :  { %v289_v16 = vld [vmem:[#allocation7 + $0x148] sm:$0xff]  ;;  %v666_v17 = vpack.c.bf16 %v293_v13, %v290_v12  ;;  %s464_s26 = sshll.u32 %s817_s1, 4  ;;  %s465_s26 = int_to_ptr.vmem [resolvable:$true] %s464_s26 }
  0x58   :  { %611 = vmatpush1.bf16.msra.mxu0 %v610_v9  ;;  %632 = vmatpush3.bf16.msra.mxu1 %v631_v15  ;;  %v283_v9 = vld [vmem:[#allocation7 + $0x118] sm:$0xff]  ;;  %v286_v15 = vld [vmem:[#allocation7 + $0x130] sm:$0xff]  ;;  %s781_s28 = scalar_lea.vmem %s465_s26, 16  ;;  %s785_s29 = scalar_lea.vmem %s465_s26, 32 }
  0x59   :  { %637 = vmatprep.subr.bf16.mxu0 %v636_v10  ;;  %633 = vmatprep.subr.bf16.mxu1 %v814_v0  ;;  %v662_v10 = vpack.c.bf16 %v287_v4, %v284_v3  ;;  %v684_v14 = vpack.c.bf16 %v283_v9, %v280_v8  ;;  %p782_p10 = scmp.ne.s32.totalorder %s465_s26, %s781_s28  ;;  %p786_p11 = scmp.lt.s32.totalorder %s465_s26, %s465_s26 }
  0x5a   :  { %p787_p12 = scmp.lt.s32.totalorder %s785_s29, %s781_s28 }
  0x5b   :  { %171 = vmatmul.mubr.f32.vlgmr.msra.gmra.mrb[0].mxu0 %v57_v18 }
  0x5c   :  { %639 = vmatpush1.bf16.msra.mxu0 %v638_v19  ;;  %360 = vmatprep.mubr.f32.mxu0 %v815_v1  ;;  %v292_v19 = vld [vmem:[#allocation7 + $0x160] sm:$0xff]  ;;  %p788_p13 = por %p787_p12, %p786_p11 }
  0x5d   :  { %641 = vmatprep.subr.bf16.mxu0 %v640_v20  ;;  %635 = vmatpush3.bf16.msra.mxu1 %v634_v25  ;;  %v295_v20 = vld [vmem:[#allocation7 + $0x178] sm:$0xff] }
  0x5e   :  { %668 = vmatprep.subr.bf16.mxu1 %v814_v0  ;;  %v690_v22 = vpack.c.bf16 %v295_v20, %v292_v19  ;;  %p789_p0 = pnand %p788_p13, %p782_p10 }
  0x60   :  { %643 = vmatpush1.bf16.msra.mxu0 %v642_v28  ;;  %543 = vmatmul.mubr.f32.vlgmr.msra.gmra.mrb[0].mxu1 %v57_v18  ;;  %v687_v18 = vpack.c.bf16 %v289_v16, %v286_v15 }
  0x61   :  { %645 = vmatprep.subr.bf16.mxu0 %v644_v29  ;;  %670 = vmatpush3.bf16.msra.mxu1 %v669_v34 }
  0x62   :  { %577 = vmatprep.mubr.msk.f32.mxu1 %vm816_vm0, %v815_v1  ;;  %671 = vmatprep.subr.bf16.mxu1 %v814_v0  ;;  %v654_v1 = vpack.c.bf16 %v275_v49, %v272_v48 }
  0x64   :  { %647 = vmatpush1.bf16.msra.mxu0 %v646_v37 }
  0x65   :  { %649 = vmatprep.subr.bf16.mxu0 %v648_v38  ;;  %673 = vmatpush3.bf16.msra.mxu1 %v672_v43 }
  0x66   :  { %674 = vmatprep.subr.bf16.mxu1 %v814_v0 }
  0x68   :  { %651 = vmatpush1.bf16.msra.mxu0 %v650_v46 }
  0x69   :  { %653 = vmatprep.subr.bf16.mxu0 %v652_v47  ;;  %676 = vmatpush3.bf16.msra.mxu1 %v675_v52 }
  0x6a   :  { %677 = vmatprep.subr.bf16.mxu1 %v814_v0 }
  0x6c   :  { %655 = vmatpush1.bf16.msra.mxu0 %v654_v1 }
  0x6d   :  { %657 = vmatprep.subr.bf16.mxu0 %v656_v55  ;;  %679 = vmatpush3.bf16.msra.mxu1 %v678_v60 }
  0x6e   :  { %680 = vmatprep.subr.bf16.mxu1 %v814_v0 }
  0x70   :  { %659 = vmatpush1.bf16.msra.mxu0 %v658_v63 }
  0x71   :  { %661 = vmatprep.subr.bf16.mxu0 %v660_v2  ;;  %682 = vmatpush3.bf16.msra.mxu1 %v681_v7 }
  0x72   :  { %683 = vmatprep.subr.bf16.mxu1 %v814_v0 }
  0x74   :  { %663 = vmatpush1.bf16.msra.mxu0 %v662_v10 }
  0x75   :  { %665 = vmatprep.subr.bf16.mxu0 %v664_v11  ;;  %685 = vmatpush3.bf16.msra.mxu1 %v684_v14 }
  0x76   :  { %686 = vmatprep.subr.bf16.mxu1 %v814_v0 }
  0x78   :  { %667 = vmatpush1.bf16.msra.mxu0 %v666_v17 }
  0x79   :  { %688 = vmatpush3.bf16.msra.mxu1 %v687_v18 }
  0x7a   :  { %689 = vmatprep.subr.bf16.mxu1 %v814_v0 }
  0x7b   :  { %361 = vmatmul.mubr.f32.vlgmr.msra.gmra.mrb[0].mxu0 %v247_v21 }
  0x7d   :  { %691 = vmatpush3.bf16.msra.mxu1 %v690_v22 }
  0x80   :  { %578 = vmatmul.mubr.f32.vlgmr.msra.gmra.mrb[2].mxu1 %v247_v21 }
 0x133   :  { %v243_v23 = vpop.f32.mrb[0].mxu1 }
 0x134   :  { %v544_v24 = vpop.f32.mrb[1].mxu1 }
 0x14e   :  { %v362_v25 = vpop.f32.mrb[0].mxu0 }
 0x14f   :  { %v474_v26 = vmul.f32 -1.442695, %v362_v25  ;;  %v364_v27 = vpop.f32.mrb[1].mxu0 }
 0x150   :  { %v475_v28 = vmul.f32 -1.442695, %v364_v27 }
 0x151   :  { %703 = vpow2.f32 %v474_v26 }
 0x152   :  { %705 = vpow2.f32 %v475_v28 }
 0x153   :  { %v433_v29 = vpop.f32.mrb[2].mxu1  ;;  %707 = vtanh.f32 %v243_v23 }
 0x154   :  { %v579_v30 = vpop.f32.mrb[3].mxu1  ;;  %709 = vtanh.f32 %v433_v29 }
 0x15b   :  { %v704_v31 = vpop.eup %703 }
 0x15c   :  { %v706_v32 = vpop.eup %705  ;;  %v441_v33 = vadd.f32 1.0, %v704_v31 }
 0x15d   :  { %v448_v34 = vadd.f32 1.0, %v706_v32  ;;  %v708_v0 = vpop.eup %707 }
 0x15e   :  { %711 = vrcp.f32 %v441_v33  ;;  %v710_v35 = vpop.eup %709 }
 0x15f   :  { %713 = vrcp.f32 %v448_v34 }
 0x168   :  { %v712_v36 = vpop.eup %711 }
 0x169   :  { %v714_v37 = vpop.eup %713  ;;  %v453_v38 = vmul.f32 %v712_v36, %v708_v0 }
 0x16a   :  { %v454_v39 = vsub.f32 1.0, %v714_v37 }
 0x16c   :  { %v455_v40 = vmul.f32 %v710_v35, %v454_v39 }
 0x16e   :  { %v456_v41 = vadd.f32 %v455_v40, %v453_v38 }
 0x170   :  { %457 = vst [vmem:[#allocation8] sm:$0x1] %v456_v41 }
 0x171   :  { %792 = shalt.err (!%p789_p0)
}
 0x172   :  { %s793_s6 = scalar_lea.hbm %s926_s4, 16 }
 0x173   :  { %p794_p1 = scmp.ne.s32.totalorder %s926_s4, %s793_s6  ;;  %p797_p2 = scmp.lt.u32.totalorder %s793_s6, %s926_s4 }
 0x175   :  { %p799_p3 = pnand %p797_p2, %p794_p1 }
 0x177   :  { %802 = shalt.err (!%p799_p3)
}
 0x178   :  { %467 = dma.vmem_to_hbm [thread:$0]  %s465_s26, 16, %s926_s4, [#allocation4]  }
 0x179   :  { %807 = dma.done.wait [#allocation4], 16  }
 0x17a   :  { %808 = vsyncadd [#allocation4], 4294967280 }
 0x17b   :  { %471 = vsyncpa [#allocation3], 1 }
 0x17c   :  { %472 = vsyncpa [#allocation6], 1 }
 0x17d   :  { %473 = vsyncpa [#allocation4], 1 }

</bundles_post_ra>
